<compile_context>
chip_gen: v5e
topology: v5e:2x2
jax: 0.10.0
libtpu: 0.0.40
codegen_flags: <defaults>
</compile_context>

<pallas_src>
import functools

import jax
import jax.numpy as jnp
from jax import lax
from jax.experimental import pallas as pl
from jax.experimental.pallas import tpu as pltpu

LN_EPS = 1e-5        # nn.LayerNorm default
_LANE = 128          # TPU lane width
_SUBLANE = 8         # TPU sublane width (f32)


def _round_up(a, b):
    return (a + b - 1) // b * b


def _mlp_subblock_kernel(x_ref, g_ref, be_ref, w1_ref, b1_ref, w2_ref, b2_ref,
                         o_ref, *, d_true):
    """One (tm, Dp) row tile of fused LayerNorm + Linear + GELU + Linear."""
    x = x_ref[...].astype(jnp.float32)                       # (tm, Dp)
    tm, dp = x.shape

    # --- LayerNorm over the *true* feature dim (PyTorch semantics) ---------
    if d_true == dp:
        mean = jnp.mean(x, axis=-1, keepdims=True)
        cent = x - mean
        var = jnp.mean(cent * cent, axis=-1, keepdims=True)  # biased variance
    else:
        # Feature dim was zero-padded d_true -> dp; normalize over real lanes
        # only (padded lanes of x, gamma, beta are zero).
        inv_d = jnp.float32(1.0 / d_true)
        valid = lax.broadcasted_iota(jnp.int32, (tm, dp), 1) < d_true
        mean = jnp.sum(x, axis=-1, keepdims=True) * inv_d
        cent = jnp.where(valid, x - mean, 0.0)
        var = jnp.sum(cent * cent, axis=-1, keepdims=True) * inv_d
    xhat = cent * lax.rsqrt(var + LN_EPS)
    xn = xhat * g_ref[...].astype(jnp.float32) + be_ref[...].astype(jnp.float32)

    # --- Linear 1: (tm, Dp) @ (Dp, Hp) + b1 — native-dtype operands, f32 acc
    h = jnp.dot(xn.astype(w1_ref.dtype), w1_ref[...],
                preferred_element_type=jnp.float32)
    h = h + b1_ref[...].astype(jnp.float32)

    # --- GELU (exact erf form == nn.GELU default) ---------------------------
    h = 0.5 * h * (1.0 + lax.erf(h * jnp.float32(0.7071067811865476)))

    # --- Linear 2: (tm, Hp) @ (Hp, Dp) + b2 ---------------------------------
    y = jnp.dot(h.astype(w2_ref.dtype), w2_ref[...],
                preferred_element_type=jnp.float32)
    y = y + b2_ref[...].astype(jnp.float32)

    o_ref[...] = y.astype(o_ref.dtype)


def mlp_subblock(x, gamma, beta, w1, b1, w2, b2, *, tm=256):
    """Fused MLPSubblock.  x: (B, N, D) -> (B, N, D)."""
    B, N, D = x.shape
    H = w1.shape[1]
    T = B * N

    # Row tile: as large as requested, but never bigger than the sublane-rounded
    # token count (avoids massive over-padding of tiny inputs).
    tm = max(_SUBLANE, min(tm, _round_up(T, _SUBLANE)))
    tm = _round_up(tm, _SUBLANE)

    Dp = _round_up(D, _LANE)          # lane-dense feature dim
    Hp = _round_up(H, _LANE)          # lane-dense hidden dim
    Tp = _round_up(T, tm)             # ragged token count -> whole tiles
    num_row_tiles = Tp // tm          # == pl.cdiv(T, tm)

    x2 = jnp.pad(x.reshape(T, D), ((0, Tp - T), (0, Dp - D)))
    gamma2 = jnp.pad(gamma.reshape(1, D), ((0, 0), (0, Dp - D)))
    beta2 = jnp.pad(beta.reshape(1, D), ((0, 0), (0, Dp - D)))
    w1p = jnp.pad(w1, ((0, Dp - D), (0, Hp - H)))
    b1p = jnp.pad(b1.reshape(1, H), ((0, 0), (0, Hp - H)))
    w2p = jnp.pad(w2, ((0, Hp - H), (0, Dp - D)))
    b2p = jnp.pad(b2.reshape(1, D), ((0, 0), (0, Dp - D)))

    # VMEM budget: resident params (double-buffered by the default pipeline,
    # DMA'd only once per core), double-buffered x/out tiles, plus the f32
    # (tm, Hp) intermediate and temporaries; generous headroom, capped at 100MB.
    wi = jnp.dtype(w1.dtype).itemsize
    xi = jnp.dtype(x.dtype).itemsize
    resident = 2 * (2 * Dp * Hp + Hp + 3 * Dp) * wi
    io_tiles = 2 * 2 * tm * Dp * xi
    interm = tm * Hp * 4 + 2 * tm * Dp * 4
    vmem_limit = int(min(100 * (1 << 20),
                         resident + io_tiles + 3 * interm + (16 << 20)))

    cost = pl.CostEstimate(
        flops=int(2 * T * D * H * 2 + 12 * T * D),
        transcendentals=int(T * H),
        bytes_accessed=int(2 * T * D * xi + (2 * D * H + H + 2 * D) * wi),
    )

    kernel = functools.partial(_mlp_subblock_kernel, d_true=D)

    out = pl.pallas_call(
        kernel,
        out_shape=jax.ShapeDtypeStruct((Tp, Dp), x.dtype),
        grid_spec=pltpu.PrefetchScalarGridSpec(
            num_scalar_prefetch=0,
            grid=(num_row_tiles,),
            in_specs=[
                pl.BlockSpec((tm, Dp), lambda i: (i, 0)),   # x row tile
                pl.BlockSpec((1, Dp), lambda i: (0, 0)),    # gamma  (resident)
                pl.BlockSpec((1, Dp), lambda i: (0, 0)),    # beta   (resident)
                pl.BlockSpec((Dp, Hp), lambda i: (0, 0)),   # W1     (resident)
                pl.BlockSpec((1, Hp), lambda i: (0, 0)),    # b1     (resident)
                pl.BlockSpec((Hp, Dp), lambda i: (0, 0)),   # W2     (resident)
                pl.BlockSpec((1, Dp), lambda i: (0, 0)),    # b2     (resident)
            ],
            out_specs=pl.BlockSpec((tm, Dp), lambda i: (i, 0)),
        ),
        compiler_params=pltpu.CompilerParams(
            dimension_semantics=("parallel",),
            vmem_limit_bytes=vmem_limit,
        ),
        cost_estimate=cost,
    )(x2, gamma2, beta2, w1p, b1p, w2p, b2p)

    return out[:T, :D].reshape(B, N, D)


def reference(x, gamma, beta, w1, b1, w2, b2):
    xf = x.astype(jnp.float32)
    mean = jnp.mean(xf, axis=-1, keepdims=True)
    var = jnp.mean((xf - mean) ** 2, axis=-1, keepdims=True)
    xn = (xf - mean) * lax.rsqrt(var + LN_EPS) * gamma + beta
    h = xn @ w1 + b1
    h = 0.5 * h * (1.0 + lax.erf(h / jnp.sqrt(2.0)))
    return (h @ w2 + b2).astype(x.dtype)


if __name__ == "__main__":
    # Small shapes consistent with the module (mlp_ratio=4): D=32 -> H=128.
    B, N, D = 2, 8, 32
    H = D * 4

    key = jax.random.PRNGKey(0)
    kx, kw1, kb1, kw2, kb2 = jax.random.split(key, 5)

    x = jax.random.normal(kx, (B, N, D), dtype=jnp.float32)
    gamma = jnp.ones((D,), jnp.float32)          # LayerNorm init
    beta = jnp.zeros((D,), jnp.float32)
    w1 = jax.random.normal(kw1, (D, H), dtype=jnp.float32) * 0.05
    b1 = jax.random.normal(kb1, (H,), dtype=jnp.float32) * 0.01
    w2 = jax.random.normal(kw2, (H, D), dtype=jnp.float32) * 0.05
    b2 = jax.random.normal(kb2, (D,), dtype=jnp.float32) * 0.01

    # 1) f32 path — must match PyTorch semantics tightly.
    y = mlp_subblock(x, gamma, beta, w1, b1, w2, b2)
    jax.block_until_ready(y)
    y_ref = reference(x, gamma, beta, w1, b1, w2, b2)
    assert jnp.allclose(y, y_ref, atol=1e-4, rtol=1e-4), "f32 mismatch vs reference"

    # 2) Ragged token count (CLS-token-like N=65) exercising cdiv/padding with
    #    multiple grid steps.
    xr = jax.random.normal(kx, (2, 65, D), dtype=jnp.float32)
    yr = mlp_subblock(xr, gamma, beta, w1, b1, w2, b2, tm=64)
    jax.block_until_ready(yr)
    yr_ref = reference(xr, gamma, beta, w1, b1, w2, b2)
    assert jnp.allclose(yr, yr_ref, atol=1e-4, rtol=1e-4), "ragged mismatch vs reference"

    # 3) bf16 activations/weights: MXU-native operands with f32 accumulation.
    bf = jnp.bfloat16
    f32 = lambda a: a.astype(jnp.float32)
    yb = mlp_subblock(x.astype(bf), gamma.astype(bf), beta.astype(bf),
                      w1.astype(bf), b1.astype(bf), w2.astype(bf), b2.astype(bf))
    jax.block_until_ready(yb)
    yb_ref = reference(f32(x.astype(bf)), f32(gamma.astype(bf)), f32(beta.astype(bf)),
                       f32(w1.astype(bf)), f32(b1.astype(bf)),
                       f32(w2.astype(bf)), f32(b2.astype(bf)))
    assert jnp.allclose(f32(yb), yb_ref, atol=5e-2, rtol=5e-2), "bf16 mismatch vs reference"

    print("KERNEL_OK")
</pallas_src>

<mosaic_0001>
module attributes {stable_mosaic.version = 11 : i64} {
  func.func @_mlp_subblock_kernel(%arg0: i32, %arg1: memref<16x128xf32, #tpu.memory_space<vmem>>, %arg2: memref<1x128xf32, #tpu.memory_space<vmem>>, %arg3: memref<1x128xf32, #tpu.memory_space<vmem>>, %arg4: memref<128x128xf32, #tpu.memory_space<vmem>>, %arg5: memref<1x128xf32, #tpu.memory_space<vmem>>, %arg6: memref<128x128xf32, #tpu.memory_space<vmem>>, %arg7: memref<1x128xf32, #tpu.memory_space<vmem>>, %arg8: memref<16x128xf32, #tpu.memory_space<vmem>>) attributes {dimension_semantics = [#tpu.dimension_semantics<parallel>], iteration_bounds = array<i64: 1>, scalar_prefetch = 0 : i64, scratch_operands = 0 : i64, tpu.core_type = #tpu.core_type<tc>, window_params = [{transform_indices = @transform_0, window_bounds = array<i64: 16, 128>}, {pipeline_mode = #tpu.pipeline_mode<synchronous>, transform_indices = @transform_1, window_bounds = array<i64: 1, 128>}, {pipeline_mode = #tpu.pipeline_mode<synchronous>, transform_indices = @transform_2, window_bounds = array<i64: 1, 128>}, {pipeline_mode = #tpu.pipeline_mode<synchronous>, transform_indices = @transform_3, window_bounds = array<i64: 128, 128>}, {pipeline_mode = #tpu.pipeline_mode<synchronous>, transform_indices = @transform_4, window_bounds = array<i64: 1, 128>}, {pipeline_mode = #tpu.pipeline_mode<synchronous>, transform_indices = @transform_5, window_bounds = array<i64: 128, 128>}, {pipeline_mode = #tpu.pipeline_mode<synchronous>, transform_indices = @transform_6, window_bounds = array<i64: 1, 128>}, {transform_indices = @transform_7, window_bounds = array<i64: 16, 128>}]} {
    %c0 = arith.constant 0 : index
    %c0_0 = arith.constant 0 : index
    %0 = vector.load %arg1[%c0, %c0_0] : memref<16x128xf32, #tpu.memory_space<vmem>>, vector<16x128xf32>
    %1 = tpu.iota {dimensions = array<i32: 1>} : vector<16x128xi32>
    %c32_i32 = arith.constant 32 : i32
    %2 = vector.broadcast %c32_i32 : i32 to vector<16x128xi32>
    %3 = arith.cmpi slt, %1, %2 : vector<16x128xi32>
    %cst = arith.constant dense<0.000000e+00> : vector<16xf32>
    %4 = vector.multi_reduction <add>, %0, %cst [1] : vector<16x128xf32> to vector<16xf32>
    %5 = vector.shape_cast %4 : vector<16xf32> to vector<16x1xf32>
    %cst_1 = arith.constant 3.125000e-02 : f32
    %6 = vector.broadcast %cst_1 : f32 to vector<16x1xf32>
    %7 = arith.mulf %5, %6 : vector<16x1xf32>
    %8 = vector.broadcast %7 : vector<16x1xf32> to vector<16x128xf32>
    %9 = arith.subf %0, %8 : vector<16x128xf32>
    %cst_2 = arith.constant 0.000000e+00 : f32
    %10 = vector.broadcast %cst_2 : f32 to vector<16x128xf32>
    %11 = arith.select %3, %9, %10 : vector<16x128xi1>, vector<16x128xf32>
    %12 = arith.mulf %11, %11 : vector<16x128xf32>
    %cst_3 = arith.constant dense<0.000000e+00> : vector<16xf32>
    %13 = vector.multi_reduction <add>, %12, %cst_3 [1] : vector<16x128xf32> to vector<16xf32>
    %14 = vector.shape_cast %13 : vector<16xf32> to vector<16x1xf32>
    %cst_4 = arith.constant 3.125000e-02 : f32
    %15 = vector.broadcast %cst_4 : f32 to vector<16x1xf32>
    %16 = arith.mulf %14, %15 : vector<16x1xf32>
    %cst_5 = arith.constant 9.99999974E-6 : f32
    %17 = vector.broadcast %cst_5 : f32 to vector<16x1xf32>
    %18 = arith.addf %16, %17 : vector<16x1xf32>
    %19 = math.rsqrt %18 : vector<16x1xf32>
    %20 = vector.broadcast %19 : vector<16x1xf32> to vector<16x128xf32>
    %21 = arith.mulf %11, %20 : vector<16x128xf32>
    %c0_6 = arith.constant 0 : index
    %c0_7 = arith.constant 0 : index
    %22 = vector.load %arg2[%c0_6, %c0_7] : memref<1x128xf32, #tpu.memory_space<vmem>>, vector<1x128xf32>
    %23 = vector.broadcast %22 : vector<1x128xf32> to vector<16x128xf32>
    %24 = arith.mulf %21, %23 : vector<16x128xf32>
    %c0_8 = arith.constant 0 : index
    %c0_9 = arith.constant 0 : index
    %25 = vector.load %arg3[%c0_8, %c0_9] : memref<1x128xf32, #tpu.memory_space<vmem>>, vector<1x128xf32>
    %26 = vector.broadcast %25 : vector<1x128xf32> to vector<16x128xf32>
    %27 = arith.addf %24, %26 : vector<16x128xf32>
    %c0_10 = arith.constant 0 : index
    %c0_11 = arith.constant 0 : index
    %28 = vector.load %arg4[%c0_10, %c0_11] : memref<128x128xf32, #tpu.memory_space<vmem>>, vector<128x128xf32>
    %cst_12 = arith.constant dense<0.000000e+00> : vector<16x128xf32>
    %29 = tpu.matmul %27, %28, %cst_12 {dimension_numbers = #tpu.dot_dimension_numbers<[1], [0], [0], [1], [0, 0, 1, 1], [], []>} : vector<16x128xf32>, vector<128x128xf32>, vector<16x128xf32> -> vector<16x128xf32>
    %c0_13 = arith.constant 0 : index
    %c0_14 = arith.constant 0 : index
    %30 = vector.load %arg5[%c0_13, %c0_14] : memref<1x128xf32, #tpu.memory_space<vmem>>, vector<1x128xf32>
    %31 = vector.broadcast %30 : vector<1x128xf32> to vector<16x128xf32>
    %32 = arith.addf %29, %31 : vector<16x128xf32>
    %cst_15 = arith.constant 5.000000e-01 : f32
    %33 = vector.broadcast %cst_15 : f32 to vector<16x128xf32>
    %34 = arith.mulf %33, %32 : vector<16x128xf32>
    %cst_16 = arith.constant 0.707106769 : f32
    %35 = vector.broadcast %cst_16 : f32 to vector<16x128xf32>
    %36 = arith.mulf %32, %35 : vector<16x128xf32>
    %37 = math.erf %36 : vector<16x128xf32>
    %cst_17 = arith.constant 1.000000e+00 : f32
    %38 = vector.broadcast %cst_17 : f32 to vector<16x128xf32>
    %39 = arith.addf %38, %37 : vector<16x128xf32>
    %40 = arith.mulf %34, %39 : vector<16x128xf32>
    %c0_18 = arith.constant 0 : index
    %c0_19 = arith.constant 0 : index
    %41 = vector.load %arg6[%c0_18, %c0_19] : memref<128x128xf32, #tpu.memory_space<vmem>>, vector<128x128xf32>
    %cst_20 = arith.constant dense<0.000000e+00> : vector<16x128xf32>
    %42 = tpu.matmul %40, %41, %cst_20 {dimension_numbers = #tpu.dot_dimension_numbers<[1], [0], [0], [1], [0, 0, 1, 1], [], []>} : vector<16x128xf32>, vector<128x128xf32>, vector<16x128xf32> -> vector<16x128xf32>
    %c0_21 = arith.constant 0 : index
    %c0_22 = arith.constant 0 : index
    %43 = vector.load %arg7[%c0_21, %c0_22] : memref<1x128xf32, #tpu.memory_space<vmem>>, vector<1x128xf32>
    %44 = vector.broadcast %43 : vector<1x128xf32> to vector<16x128xf32>
    %45 = arith.addf %42, %44 : vector<16x128xf32>
    %c0_23 = arith.constant 0 : index
    %c0_24 = arith.constant 0 : index
    %46 = vector.load %arg8[%c0_23, %c0_24] : memref<16x128xf32, #tpu.memory_space<vmem>>, vector<16x128xf32>
    tpu.vector_store %arg8[%c0_23, %c0_24], %45 {strides = array<i32>} : memref<16x128xf32, #tpu.memory_space<vmem>>, vector<16x128xf32>,
    return
  }
  func.func @transform_0(%arg0: i32) -> (i32, i32) {
    %c0_i32 = arith.constant 0 : i32
    %c0_i32_0 = arith.constant 0 : i32
    return %arg0, %c0_i32 : i32, i32
  }
  func.func @transform_1(%arg0: i32) -> (i32, i32) {
    %c0_i32 = arith.constant 0 : i32
    %c0_i32_0 = arith.constant 0 : i32
    %c0_i32_1 = arith.constant 0 : i32
    return %c0_i32, %c0_i32_0 : i32, i32
  }
  func.func @transform_2(%arg0: i32) -> (i32, i32) {
    %c0_i32 = arith.constant 0 : i32
    %c0_i32_0 = arith.constant 0 : i32
    %c0_i32_1 = arith.constant 0 : i32
    return %c0_i32, %c0_i32_0 : i32, i32
  }
  func.func @transform_3(%arg0: i32) -> (i32, i32) {
    %c0_i32 = arith.constant 0 : i32
    %c0_i32_0 = arith.constant 0 : i32
    %c0_i32_1 = arith.constant 0 : i32
    return %c0_i32, %c0_i32_0 : i32, i32
  }
  func.func @transform_4(%arg0: i32) -> (i32, i32) {
    %c0_i32 = arith.constant 0 : i32
    %c0_i32_0 = arith.constant 0 : i32
    %c0_i32_1 = arith.constant 0 : i32
    return %c0_i32, %c0_i32_0 : i32, i32
  }
  func.func @transform_5(%arg0: i32) -> (i32, i32) {
    %c0_i32 = arith.constant 0 : i32
    %c0_i32_0 = arith.constant 0 : i32
    %c0_i32_1 = arith.constant 0 : i32
    return %c0_i32, %c0_i32_0 : i32, i32
  }
  func.func @transform_6(%arg0: i32) -> (i32, i32) {
    %c0_i32 = arith.constant 0 : i32
    %c0_i32_0 = arith.constant 0 : i32
    %c0_i32_1 = arith.constant 0 : i32
    return %c0_i32, %c0_i32_0 : i32, i32
  }
  func.func @transform_7(%arg0: i32) -> (i32, i32) {
    %c0_i32 = arith.constant 0 : i32
    %c0_i32_0 = arith.constant 0 : i32
    return %arg0, %c0_i32 : i32, i32
  }
}

</mosaic_0001>

<bundles_post_ra>
// kernel: tpu_custom_call.1
= control target key start
LH: loop header
LB: loop body
LE: loop exit
PB: predicated region body
PF: predicated region fallthrough
CT: control target
= control target key end

     0   :  { %12 = vsyncpa [#allocation3], 0  ;;  %s648_s0 = inlined_call_operand.hbm [shape: f32[16,128], index: 0, kind: input, shape index: {}]   ;;  %s649_s1 = inlined_call_operand.hbm [shape: f32[1,128], index: 1, kind: input, shape index: {}]   ;;  %s650_s2 = inlined_call_operand.vmem [shape: f32[1,128], index: 2, kind: input, shape index: {}]   ;;  %s651_s3 = inlined_call_operand.hbm [shape: f32[128,128], index: 3, kind: input, shape index: {}]   ;;  %s652_s4 = inlined_call_operand.vmem [shape: f32[1,128], index: 4, kind: input, shape index: {}]   ;;  %s653_s5 = inlined_call_operand.hbm [shape: f32[128,128], index: 5, kind: input, shape index: {}]   ;;  %s654_s6 = inlined_call_operand.vmem [shape: f32[1,128], index: 6, kind: input, shape index: {}]   ;;  %s655_s7 = inlined_call_operand.hbm [shape: f32[16,128], index: 7, kind: output, shape index: {}]  }
   0x1   :  { %13 = vsyncpa [#allocation6], 0 }
   0x2   :  { %14 = vsyncpa [#allocation9], 0  ;;  %s34_s26 = sshll.u32 %s649_s1, 4  ;;  %s35_s26 = int_to_ptr.hbm [resolvable:$true] %s34_s26 }
   0x3   :  { %15 = vsyncpa [#allocation4], 0  ;;  %s525_s27 = smov [#allocation5]   ;;  %s20_s8 = sshll.u32 %s648_s0, 4  ;;  %s21_s8 = int_to_ptr.hbm [resolvable:$true] %s20_s8 }
   0x4   :  { %s36_s28 = sshll.u32 %s525_s27, 4  ;;  %s526_s9 = smov [#allocation2]   ;;  %s37_s28 = int_to_ptr.vmem [resolvable:$true] %s36_s28 }
   0x5   :  { %39 = dma.hbm_to_vmem [thread:$0]  %s35_s26, 16, %s37_s28, [#allocation6]  }
   0x6   :  { %s22_s10 = sshll.u32 %s526_s9, 4  ;;  %s527_s11 = smov 128   ;;  %s23_s10 = int_to_ptr.vmem [resolvable:$true] %s22_s10 }
   0x7   :  { %s528_s12 = smov 8   ;;  %s46_s14 = sshll.u32 %s651_s3, 4  ;;  %s47_s14 = int_to_ptr.hbm [resolvable:$true] %s46_s14 }
   0x8   :  { %28 = dma.hbm_to_vmem [thread:$0]  %s21_s8, 256, %s23_s10, [#allocation3], %s527_s11, %s527_s11, %s528_s12  }
   0x9   :  { %s529_s15 = smov [#allocation7]   ;;  %s61_s18 = sshll.u32 %s653_s5, 4  ;;  %s62_s18 = int_to_ptr.hbm [resolvable:$true] %s61_s18 }
   0xa   :  { %s48_s16 = sshll.u32 %s529_s15, 4  ;;  %s530_s19 = smov [#allocation8]   ;;  %s49_s16 = int_to_ptr.vmem [resolvable:$true] %s48_s16 }
   0xb   :  { %54 = dma.hbm_to_vmem [thread:$0]  %s47_s14, 2048, %s49_s16, [#allocation6], %s527_s11, %s527_s11, %s528_s12  }
   0xc   :  { %s63_s20 = sshll.u32 %s530_s19, 4  ;;  %s64_s20 = int_to_ptr.vmem [resolvable:$true] %s63_s20 }
   0xd   :  { %69 = dma.hbm_to_vmem [thread:$0]  %s62_s18, 2048, %s64_s20, [#allocation9], %s527_s11, %s527_s11, %s528_s12  }
   0xe   :  { %517 = dma.done.wait [#allocation3], 256  }
   0xf   :  { %518 = vsyncadd [#allocation3], 4294967040 }
  0x10   :  { %519 = dma.done.wait [#allocation6], 2064  }
  0x11   :  { %520 = vsyncadd [#allocation6], 4294965232 }
  0x12   :  { %521 = dma.done.wait [#allocation9], 2048  }
  0x13   :  { %522 = vsyncadd [#allocation9], 4294965248  ;;  %v89_v0 = vld [vmem:[#allocation2 + $0x8] sm:$0xff]  ;;  %v88_v1 = vld [vmem:[#allocation2] sm:$0xff]  ;;  %v90_v4 = vlaneseq  ;;  %s531_s23 = smov [#allocation10]   ;;  %s329_s27 = sshll.u32 %s655_s7, 4  ;;  %s330_s27 = int_to_ptr.hbm [resolvable:$true] %s329_s27 }
  0x14   :  { %95 = vadd.xlane.f32.xlu0 %v89_v0  ;;  %v162_v2 = vld [vmem:[#allocation7 + $0x78] sm:$0xff]  ;;  %v161_v3 = vld [vmem:[#allocation7 + $0x70] sm:$0xff]  ;;  %v160_v16 = vld [vmem:[#allocation7 + $0x68] sm:$0xff]  ;;  %s327_s24 = sshll.u32 %s531_s23, 4  ;;  %s328_s24 = int_to_ptr.vmem [resolvable:$true] %s327_s24 }
  0x15   :  { %346 = vmatpush.msra.mxu2 %v162_v2  ;;  %167 = vmatpush.msra.mxu0 %v162_v2  ;;  %v91_v5 = vand.u32 127, %v90_v4  ;;  %v159_v17 = vld [vmem:[#allocation7 + $0x60] sm:$0xff]  ;;  %v158_v18 = vld [vmem:[#allocation7 + $0x58] sm:$0xff]  ;;  %v157_v19 = vld [vmem:[#allocation7 + $0x50] sm:$0xff] }
  0x16   :  { %v156_v20 = vld [vmem:[#allocation7 + $0x48] sm:$0xff]  ;;  %v155_v21 = vld [vmem:[#allocation7 + $0x40] sm:$0xff]  ;;  %v154_v22 = vld [vmem:[#allocation7 + $0x38] sm:$0xff] }
  0x17   :  { %347 = vmatpush.msra.mxu2 %v161_v3  ;;  %168 = vmatpush.msra.mxu0 %v161_v3  ;;  %vm92_vm0 = vcmp.lt.s32.totalorder %v91_v5, 32  ;;  %v153_v23 = vld [vmem:[#allocation7 + $0x30] sm:$0xff]  ;;  %v152_v24 = vld [vmem:[#allocation7 + $0x28] sm:$0xff]  ;;  %v151_v25 = vld [vmem:[#allocation7 + $0x20] sm:$0xff] }
  0x18   :  { %v150_v26 = vld [vmem:[#allocation7 + $0x18] sm:$0xff]  ;;  %v149_v27 = vld [vmem:[#allocation7 + $0x10] sm:$0xff]  ;;  %v148_v28 = vld [vmem:[#allocation7 + $0x8] sm:$0xff] }
  0x19   :  { %348 = vmatpush.msra.mxu2 %v160_v16  ;;  %169 = vmatpush.msra.mxu0 %v160_v16  ;;  %v147_v29 = vld [vmem:[#allocation7] sm:$0xff]  ;;  %v385_v44 = vld [vmem:[#allocation5] ss:$0 sm:$0xff]  ;;  %v386_v48 = vld [vmem:[%s650_s2] ss:$0 sm:$0xff] }
  0x1a   :  { %v293_v58 = vld [vmem:[#allocation8 + $0x78] sm:$0xff]  ;;  %v292_v59 = vld [vmem:[#allocation8 + $0x70] sm:$0xff]  ;;  %v291_v60 = vld [vmem:[#allocation8 + $0x68] sm:$0xff] }
  0x1b   :  { %349 = vmatpush.msra.mxu2 %v159_v17  ;;  %170 = vmatpush.msra.mxu0 %v159_v17  ;;  %v290_v61 = vld [vmem:[#allocation8 + $0x60] sm:$0xff]  ;;  %v387_v62 = vld [vmem:[%s652_s4] ss:$0 sm:$0xff]  ;;  %v289_v63 = vld [vmem:[#allocation8 + $0x58] sm:$0xff] }
  0x1c   :  { %93 = vadd.xlane.f32.xlu0 %v88_v1  ;;  %362 = vmatpush.msra.mxu3 %v293_v58  ;;  %v287_v2 = vld [vmem:[#allocation8 + $0x48] sm:$0xff]  ;;  %v286_v5 = vld [vmem:[#allocation8 + $0x40] sm:$0xff] }
  0x1d   :  { %350 = vmatpush.msra.mxu2 %v158_v18  ;;  %171 = vmatpush.msra.mxu0 %v158_v18  ;;  %v282_v18 = vld [vmem:[#allocation8 + $0x20] sm:$0xff] }
  0x1e   :  { %298 = vmatpush.msra.mxu1 %v293_v58  ;;  %363 = vmatpush.msra.mxu3 %v292_v59 }
  0x1f   :  { %351 = vmatpush.msra.mxu2 %v157_v19  ;;  %172 = vmatpush.msra.mxu0 %v157_v19 }
  0x20   :  { %299 = vmatpush.msra.mxu1 %v292_v59  ;;  %364 = vmatpush.msra.mxu3 %v291_v60 }
  0x21   :  { %352 = vmatpush.msra.mxu2 %v156_v20  ;;  %173 = vmatpush.msra.mxu0 %v156_v20 }
  0x22   :  { %300 = vmatpush.msra.mxu1 %v291_v60  ;;  %365 = vmatpush.msra.mxu3 %v290_v61 }
  0x23   :  { %353 = vmatpush.msra.mxu2 %v155_v21  ;;  %174 = vmatpush.msra.mxu0 %v155_v21 }
  0x24   :  { %301 = vmatpush.msra.mxu1 %v290_v61  ;;  %366 = vmatpush.msra.mxu3 %v289_v63 }
  0x25   :  { %354 = vmatpush.msra.mxu2 %v154_v22  ;;  %175 = vmatpush.msra.mxu0 %v154_v22  ;;  %v281_v22 = vld [vmem:[#allocation8 + $0x18] sm:$0xff] }
  0x26   :  { %302 = vmatpush.msra.mxu1 %v289_v63 }
  0x27   :  { %355 = vmatpush.msra.mxu2 %v153_v23  ;;  %176 = vmatpush.msra.mxu0 %v153_v23 }
  0x29   :  { %356 = vmatpush.msra.mxu2 %v152_v24  ;;  %177 = vmatpush.msra.mxu0 %v152_v24 }
  0x2b   :  { %357 = vmatpush.msra.mxu2 %v151_v25  ;;  %178 = vmatpush.msra.mxu0 %v151_v25 }
  0x2d   :  { %358 = vmatpush.msra.mxu2 %v150_v26  ;;  %179 = vmatpush.msra.mxu0 %v150_v26 }
  0x2f   :  { %359 = vmatpush.msra.mxu2 %v149_v27  ;;  %180 = vmatpush.msra.mxu0 %v149_v27  ;;  %v280_v27 = vld [vmem:[#allocation8 + $0x10] sm:$0xff] }
  0x31   :  { %360 = vmatpush.msra.mxu2 %v148_v28  ;;  %181 = vmatpush.msra.mxu0 %v148_v28 }
  0x33   :  { %361 = vmatpush.msra.mxu2 %v147_v29  ;;  %182 = vmatpush.msra.mxu0 %v147_v29 }
  0x87   :  { %v96_v6 = vpop.xlane.xlu0 %95 }
  0x88   :  { %v98_v7 = vmul.f32 0.03125, %v96_v6 }
  0x8a   :  { %v100_v8 = vsub.f32 %v89_v0, %v98_v7  ;;  %v288_v0 = vld [vmem:[#allocation8 + $0x50] sm:$0xff] }
  0x8b   :  { %367 = vmatpush.msra.mxu3 %v288_v0  ;;  %303 = vmatpush.msra.mxu1 %v288_v0 }
  0x8c   :  { %v593_v9 = vsel %vm92_vm0, %v100_v8, 0.0  ;;  %v285_v8 = vld [vmem:[#allocation8 + $0x38] sm:$0xff] }
  0x8d   :  { %v104_v10 = vmul.f32 %v593_v9, %v593_v9  ;;  %368 = vmatpush.msra.mxu3 %v287_v2  ;;  %304 = vmatpush.msra.mxu1 %v287_v2 }
  0x8f   :  { %107 = vadd.xlane.f32.xlu1 %v104_v10  ;;  %v94_v11 = vpop.xlane.xlu0 %93  ;;  %369 = vmatpush.msra.mxu3 %v286_v5 }
  0x90   :  { %v97_v12 = vmul.f32 0.03125, %v94_v11  ;;  %305 = vmatpush.msra.mxu1 %v286_v5  ;;  %v284_v11 = vld [vmem:[#allocation8 + $0x30] sm:$0xff] }
  0x91   :  { %370 = vmatpush.msra.mxu3 %v285_v8 }
  0x92   :  { %v99_v13 = vsub.f32 %v88_v1, %v97_v12  ;;  %306 = vmatpush.msra.mxu1 %v285_v8 }
  0x93   :  { %371 = vmatpush.msra.mxu3 %v284_v11 }
  0x94   :  { %v597_v14 = vsel %vm92_vm0, %v99_v13, 0.0  ;;  %307 = vmatpush.msra.mxu1 %v284_v11 }
  0x95   :  { %v103_v15 = vmul.f32 %v597_v14, %v597_v14 }
  0x97   :  { %105 = vadd.xlane.f32.xlu1 %v103_v15 }
 0x102   :  { %v108_v30 = vpop.xlane.xlu1 %107 }
 0x103   :  { %v110_v31 = vmul.f32 0.03125, %v108_v30 }
 0x105   :  { %v112_v32 = vadd.f32 1e-05, %v110_v31 }
 0x107   :  { %389 = vrsqrt.f32 %v112_v32  ;;  %vm129_vm2 = vweird.f32 %v112_v32 }
 0x10a   :  { %v106_v33 = vpop.xlane.xlu1 %105 }
 0x10b   :  { %v109_v34 = vmul.f32 0.03125, %v106_v33 }
 0x10d   :  { %v390_v35 = vpop.eup %389  ;;  %v111_v36 = vadd.f32 1e-05, %v109_v34 }
 0x10e   :  { %v124_v37 = vmul.f32 %v390_v35, %v112_v32  ;;  %vm130_vm1 = vweird.f32 %v390_v35  ;;  %v279_v32 = vld [vmem:[#allocation8 + $0x8] sm:$0xff] }
 0x10f   :  { %391 = vrsqrt.f32 %v111_v36  ;;  %vm131_vm3 = vmor %vm129_vm2, %vm130_vm1  ;;  %vm119_vm5 = vweird.f32 %v111_v36 }
 0x110   :  { %v125_v38 = vmul.f32 %v390_v35, %v124_v37 }
 0x112   :  { %v126_v39 = vmul.f32 0.5, %v125_v38 }
 0x114   :  { %v127_v40 = vsub.f32 1.5, %v126_v39 }
 0x115   :  { %v392_v41 = vpop.eup %391 }
 0x116   :  { %v128_v42 = vmul.f32 %v390_v35, %v127_v40  ;;  %v114_v43 = vmul.f32 %v392_v41, %v111_v36  ;;  %vm120_vm4 = vweird.f32 %v392_v41  ;;  %v278_v36 = vld [vmem:[#allocation8] sm:$0xff] }
 0x117   :  { %vm121_vm6 = vmor %vm119_vm5, %vm120_vm4 }
 0x118   :  { %v115_v45 = vmul.f32 %v392_v41, %v114_v43  ;;  %v132_v46 = vsel %vm131_vm3, %v390_v35, %v128_v42 }
 0x119   :  { %v134_v47 = vmul.f32 %v132_v46, %v593_v9 }
 0x11a   :  { %v116_v49 = vmul.f32 0.5, %v115_v45 }
 0x11b   :  { %v140_v50 = vmul.f32 %v385_v44, %v134_v47 }
 0x11c   :  { %v117_v51 = vsub.f32 1.5, %v116_v49 }
 0x11d   :  { %v146_v52 = vadd.f32 %v386_v48, %v140_v50 }
 0x11e   :  { %v118_v53 = vmul.f32 %v392_v41, %v117_v51 }
 0x11f   :  { %186 = vmatmul.f32.vlgmr.msra.gmra.mxu2 %v146_v52 }
 0x120   :  { %v122_v54 = vsel %vm121_vm6, %v392_v41, %v118_v53 }
 0x121   :  { %v133_v55 = vmul.f32 %v122_v54, %v597_v14  ;;  %v283_v14 = vld [vmem:[#allocation8 + $0x28] sm:$0xff] }
 0x122   :  { %372 = vmatpush.msra.mxu3 %v283_v14  ;;  %308 = vmatpush.msra.mxu1 %v283_v14 }
 0x123   :  { %v139_v56 = vmul.f32 %v385_v44, %v133_v55 }
 0x124   :  { %373 = vmatpush.msra.mxu3 %v282_v18  ;;  %309 = vmatpush.msra.mxu1 %v282_v18 }
 0x125   :  { %v145_v57 = vadd.f32 %v386_v48, %v139_v56 }
 0x126   :  { %374 = vmatpush.msra.mxu3 %v281_v22  ;;  %310 = vmatpush.msra.mxu1 %v281_v22 }
 0x127   :  { %183 = vmatmul.f32.vlgmr.msra.gmra.mxu0 %v145_v57 }
 0x128   :  { %375 = vmatpush.msra.mxu3 %v280_v27  ;;  %311 = vmatpush.msra.mxu1 %v280_v27 }
 0x12a   :  { %376 = vmatpush.msra.mxu3 %v279_v32  ;;  %312 = vmatpush.msra.mxu1 %v279_v32 }
 0x12c   :  { %377 = vmatpush.msra.mxu3 %v278_v36  ;;  %313 = vmatpush.msra.mxu1 %v278_v36 }
 0x1a2   :  { %v187_v1 = vpop.f32.mrf.mxu2 }
 0x1a3   :  { %v609_v3 = vadd.f32 %v387_v62, %v187_v1 }
 0x1a4   :  { %v184_v4 = vpop.f32.mrf.mxu0 }
 0x1a5   :  { %v612_v6 = vmul.f32 0.70710677, %v609_v3  ;;  %v614_v7 = vadd.f32 %v387_v62, %v184_v4 }
 0x1a7   :  { %v234_v9 = vmul.f32 %v612_v6, %v612_v6  ;;  %v619_v10 = vmul.f32 0.70710677, %v614_v7 }
 0x1a9   :  { %v621_v12 = vmin.f32 %v234_v9, 16.0  ;;  %v194_v13 = vmul.f32 %v619_v10, %v619_v10 }
 0x1ab   :  { %v236_v15 = vmul.f32 2.1237322e-06, %v621_v12  ;;  %v195_v16 = vmin.f32 %v194_v13, 16.0  ;;  %v247_v17 = vmul.f32 3.8918573e-05, %v621_v12 }
 0x1ad   :  { %v237_v19 = vadd.f32 0.00028619796, %v236_v15  ;;  %v196_v20 = vmul.f32 2.1237322e-06, %v195_v16  ;;  %v248_v21 = vadd.f32 0.001143296, %v247_v17 }
 0x1ae   :  { %v207_v23 = vmul.f32 3.8918573e-05, %v195_v16 }
 0x1af   :  { %v238_v24 = vmul.f32 %v237_v19, %v621_v12  ;;  %v197_v25 = vadd.f32 0.00028619796, %v196_v20  ;;  %v249_v26 = vmul.f32 %v248_v21, %v621_v12 }
 0x1b0   :  { %v208_v28 = vadd.f32 0.001143296, %v207_v23 }
 0x1b1   :  { %v198_v29 = vmul.f32 %v197_v25, %v195_v16  ;;  %v250_v30 = vadd.f32 0.014752088, %v249_v26  ;;  %v239_v31 = vadd.f32 0.0036580483, %v238_v24  ;;  %v191_v26 = vmul.f32 0.5, %v609_v3 }
 0x1b2   :  { %v209_v33 = vmul.f32 %v208_v28, %v195_v16 }
 0x1b3   :  { %v251_v34 = vmul.f32 %v250_v30, %v621_v12  ;;  %v199_v35 = vadd.f32 0.0036580483, %v198_v29  ;;  %v240_v39 = vmul.f32 %v239_v31, %v621_v12  ;;  %v190_v29 = vmul.f32 0.5, %v614_v7 }
 0x1b4   :  { %v210_v37 = vadd.f32 0.014752088, %v209_v33 }
 0x1b5   :  { %v252_v38 = vadd.f32 0.112945676, %v251_v34  ;;  %v200_v42 = vmul.f32 %v199_v35, %v195_v16  ;;  %v241_v45 = vadd.f32 0.05243302, %v240_v39 }
 0x1b6   :  { %v211_v40 = vmul.f32 %v210_v37, %v195_v16 }
 0x1b7   :  { %v253_v41 = vmul.f32 %v252_v38, %v621_v12  ;;  %v201_v48 = vadd.f32 0.05243302, %v200_v42  ;;  %v242_v51 = vmul.f32 %v241_v45, %v621_v12 }
 0x1b8   :  { %v212_v43 = vadd.f32 0.112945676, %v211_v40 }
 0x1b9   :  { %v254_v44 = vadd.f32 0.4994258, %v253_v41  ;;  %v202_v53 = vmul.f32 %v201_v48, %v195_v16  ;;  %v243_v55 = vadd.f32 0.18741608, %v242_v51 }
 0x1ba   :  { %v213_v46 = vmul.f32 %v212_v43, %v195_v16 }
 0x1bb   :  { %v255_v47 = vmul.f32 %v254_v44, %v621_v12  ;;  %v203_v56 = vadd.f32 0.18741608, %v202_v53  ;;  %v244_v58 = vmul.f32 %v243_v55, %v621_v12 }
 0x1bc   :  { %v214_v49 = vadd.f32 0.4994258, %v213_v46 }
 0x1bd   :  { %v256_v50 = vadd.f32 1.0, %v255_v47  ;;  %v204_v61 = vmul.f32 %v203_v56, %v195_v16  ;;  %v245_v1 = vadd.f32 1.1283791, %v244_v58 }
 0x1be   :  { %v215_v52 = vmul.f32 %v214_v49, %v195_v16 }
 0x1bf   :  { %393 = vrcp.f32 %v256_v50  ;;  %v268_v63 = vand.u32 2147483648, %v256_v50  ;;  %v266_v4 = vand.u32 2147483647, %v256_v50  ;;  %v205_v8 = vadd.f32 1.1283791, %v204_v61 }
 0x1c0   :  { %v216_v54 = vadd.f32 1.0, %v215_v52  ;;  %vm262_vm8 = vweird.f32 %v256_v50  ;;  %v246_v15 = vmul.f32 %v245_v1, %v612_v6 }
 0x1c1   :  { %v269_v13 = vor.u32 1.1754944e-38, %v268_v63  ;;  %vm267_vm11 = vcmp.eq.f32.partialorder %v266_v4, 8.507059e+37  ;;  %v206_v21 = vmul.f32 %v205_v8, %v619_v10  ;;  %v388_v10 = vld [vmem:[%s654_s6] ss:$0 sm:$0xff] }
 0x1c2   :  { %395 = vrcp.f32 %v216_v54  ;;  %v228_v11 = vand.u32 2147483648, %v216_v54  ;;  %v226_v12 = vand.u32 2147483647, %v216_v54  ;;  %vm222_vm12 = vweird.f32 %v216_v54 }
 0x1c4   :  { %v229_v20 = vor.u32 1.1754944e-38, %v228_v11  ;;  %vm227_vm14 = vcmp.eq.f32.partialorder %v226_v12, 8.507059e+37 }
 0x1c5   :  { %v394_v57 = vpop.eup %393 }
 0x1c6   :  { %v258_v59 = vmul.f32 %v394_v57, %v256_v50  ;;  %vm263_vm7 = vweird.f32 %v394_v57 }
 0x1c7   :  { %vm264_vm9 = vmor %vm262_vm8, %vm263_vm7 }
 0x1c8   :  { %v396_v60 = vpop.eup %395  ;;  %v259_v62 = vsub.f32 1.0, %v258_v59 }
 0x1c9   :  { %v218_v0 = vmul.f32 %v396_v60, %v216_v54  ;;  %vm223_vm10 = vweird.f32 %v396_v60 }
 0x1ca   :  { %v260_v2 = vmul.f32 %v394_v57, %v259_v62  ;;  %vm224_vm13 = vmor %vm222_vm12, %vm223_vm10 }
 0x1cb   :  { %v219_v5 = vsub.f32 1.0, %v218_v0 }
 0x1cc   :  { %v261_v9 = vadd.f32 %v394_v57, %v260_v2 }
 0x1cd   :  { %v220_v14 = vmul.f32 %v396_v60, %v219_v5 }
 0x1ce   :  { %v265_v16 = vsel %vm264_vm9, %v394_v57, %v261_v9 }
 0x1cf   :  { %v270_v17 = vsel %vm267_vm11, %v269_v13, %v265_v16  ;;  %v221_v18 = vadd.f32 %v396_v60, %v220_v14 }
 0x1d0   :  { %v271_v19 = vmul.f32 %v270_v17, %v246_v15 }
 0x1d1   :  { %v225_v22 = vsel %vm224_vm13, %v396_v60, %v221_v18 }
 0x1d2   :  { %v345_v23 = vclamps-f32 %v271_v19, 1.0  ;;  %v230_v24 = vsel %vm227_vm14, %v229_v20, %v225_v22 }
 0x1d3   :  { %v231_v25 = vmul.f32 %v230_v24, %v206_v21 }
 0x1d4   :  { %v275_v27 = vadd.f32 1.0, %v345_v23 }
 0x1d5   :  { %v344_v28 = vclamps-f32 %v231_v25, 1.0 }
 0x1d6   :  { %v277_v6 = vmul.f32 %v275_v27, %v191_v26 }
 0x1d7   :  { %v274_v30 = vadd.f32 1.0, %v344_v28 }
 0x1d8   :  { %317 = vmatmul.f32.vlgmr.msra.gmra.mxu3 %v277_v6 }
 0x1d9   :  { %v276_v31 = vmul.f32 %v274_v30, %v190_v29 }
 0x1db   :  { %314 = vmatmul.f32.vlgmr.msra.gmra.mxu1 %v276_v31 }
 0x258   :  { %v315_v32 = vpop.f32.mrf.mxu1 }
 0x259   :  { %v316_v33 = vadd.f32 %v388_v10, %v315_v32 }
 0x25b   :  { %321 = vst [vmem:[#allocation10] sm:$0xff] %v316_v33  ;;  %v318_v3 = vpop.f32.mrf.mxu3 }
 0x25c   :  { %v319_v34 = vadd.f32 %v388_v10, %v318_v3 }
 0x25e   :  { %322 = vst [vmem:[#allocation10 + $0x8] sm:$0xff] %v319_v34 }
 0x25f   :  { %335 = dma.vmem_to_hbm [thread:$0]  %s328_s24, 256, %s330_s27, [#allocation4], %s527_s11, %s527_s11, %s528_s12  }
 0x260   :  { %523 = dma.done.wait [#allocation4], 256  }
 0x261   :  { %524 = vsyncadd [#allocation4], 4294967040 }
 0x262   :  { %340 = vsyncpa [#allocation3], 1 }
 0x263   :  { %341 = vsyncpa [#allocation6], 1 }
 0x264   :  { %342 = vsyncpa [#allocation9], 1 }
 0x265   :  { %343 = vsyncpa [#allocation4], 1 }

</bundles_post_ra>
